<compile_context>
chip_gen: v7x
topology: tpu7x:2x2x1
jax: 0.10.0
libtpu: 0.0.40
codegen_flags: <defaults>
</compile_context>

<pallas_src>
import jax
import jax.numpy as jnp
from jax import lax
from jax.experimental import pallas as pl
from jax.experimental.pallas import tpu as pltpu

SHININESS = 64      # static, matches the module's default argument
LANE = 128          # lane width (points per row)
CHUNK = 32          # sublane-rows per in-kernel sub-chunk (keeps chain in vregs)
TR_MAX = 512        # max sublane-rows of 128 points per grid step
EPS = 1e-6          # F.normalize eps used by pytorch3d lighting


def lighting_kernel(params_ref, in_ref, out_ref):
    # params (SMEM, f32[16]):
    #   [0:3] light location, [3:6] camera position,
    #   [6:9] ambient color, [9:12] diffuse color, [12:15] specular color
    lx, ly, lz = params_ref[0], params_ref[1], params_ref[2]
    cx, cy, cz = params_ref[3], params_ref[4], params_ref[5]
    amb = (params_ref[6], params_ref[7], params_ref[8])
    dif = (params_ref[9], params_ref[10], params_ref[11])
    spe = (params_ref[12], params_ref[13], params_ref[14])

    eps2 = EPS * EPS
    n_chunks = in_ref.shape[1] // CHUNK   # static

    def body(c_idx, carry):
        r = pl.multiple_of(c_idx * CHUNK, CHUNK)

        # in_ref rows: 0:3 points xyz, 3:6 normals xyz, 6:9 rgb (lane = point).
        px = in_ref[0, pl.ds(r, CHUNK), :]
        py = in_ref[1, pl.ds(r, CHUNK), :]
        pz = in_ref[2, pl.ds(r, CHUNK), :]
        nx = in_ref[3, pl.ds(r, CHUNK), :]
        ny = in_ref[4, pl.ds(r, CHUNK), :]
        nz = in_ref[5, pl.ds(r, CHUNK), :]

        # normalize normals: v * rsqrt(max(||v||^2, eps^2)) == v / max(||v||, eps)
        n_inv = lax.rsqrt(jnp.maximum(nx * nx + ny * ny + nz * nz, eps2))
        nx, ny, nz = nx * n_inv, ny * n_inv, nz * n_inv

        # light direction = light_location - points, normalized
        dx, dy, dz = lx - px, ly - py, lz - pz
        d_inv = lax.rsqrt(jnp.maximum(dx * dx + dy * dy + dz * dz, eps2))
        dx, dy, dz = dx * d_inv, dy * d_inv, dz * d_inv

        cos_angle = nx * dx + ny * dy + nz * dz
        diff_angle = jnp.maximum(cos_angle, 0.0)

        # view direction = camera_position - points, normalized
        vx, vy, vz = cx - px, cy - py, cz - pz
        v_inv = lax.rsqrt(jnp.maximum(vx * vx + vy * vy + vz * vz, eps2))
        vx, vy, vz = vx * v_inv, vy * v_inv, vz * v_inv

        # reflection direction + masked specular base (select instead of cast*mul)
        two_cos = 2.0 * cos_angle
        rx = two_cos * nx - dx
        ry = two_cos * ny - dy
        rz = two_cos * nz - dz
        v_dot_r = vx * rx + vy * ry + vz * rz
        alpha = jnp.where(cos_angle > 0.0, jnp.maximum(v_dot_r, 0.0), 0.0)

        # alpha ** 64 via repeated squaring (VALU-only, no exp/log)
        a2 = alpha * alpha
        a4 = a2 * a2
        a8 = a4 * a4
        a16 = a8 * a8
        a32 = a16 * a16
        alpha_pow = a32 * a32

        # out[c] = rgb[c] * (ambient[c] + diffuse[c]*angle) + specular[c]*alpha^64
        for c in range(3):
            rgb = in_ref[6 + c, pl.ds(r, CHUNK), :]
            out_ref[c, pl.ds(r, CHUNK), :] = (
                rgb * (amb[c] + dif[c] * diff_angle) + spe[c] * alpha_pow)
        return carry

    lax.fori_loop(0, n_chunks, body, 0, unroll=True)


def _round_up(x, m):
    return ((x + m - 1) // m) * m


def _tile_plan(P, tr_max=TR_MAX):
    """Balanced, CHUNK-aligned tiling with an even grid (>=2) for v7x megacore."""
    nr = pl.cdiv(P, LANE)                    # rows of 128 points needed
    steps = max(2, pl.cdiv(nr, tr_max))      # >= 2 so both v7x TCs get work
    steps += steps % 2                       # even split across 2 TCs
    tr = max(CHUNK, _round_up(pl.cdiv(nr, steps), CHUNK))
    nr_pad = steps * tr
    return steps, tr, nr_pad


def lighting_texture_forward_planes(packed_planes, params, tr):
    """Channel-major fast path — no host-side layout transforms.

    packed_planes: (9, nr_pad, 128) f32; rows 0:3 points, 3:6 normals, 6:9 rgb.
    params:        (16,) f32 [light(3), cam(3), ambient(3), diffuse(3), specular(3), pad].
    Returns (3, nr_pad, 128) shaded rgb, channel-major.
    Padded rows (zero normals/points) produce finite garbage; callers must ignore them.
    """
    nine, nr_pad, lane = packed_planes.shape
    assert nine == 9 and lane == LANE
    assert tr % CHUNK == 0 and nr_pad % tr == 0
    grid = nr_pad // tr

    return pl.pallas_call(
        lighting_kernel,
        out_shape=jax.ShapeDtypeStruct((3, nr_pad, LANE), jnp.float32),
        grid=(grid,),
        in_specs=[
            pl.BlockSpec(memory_space=pltpu.MemorySpace.SMEM),        # scalar params
            pl.BlockSpec((9, tr, LANE), lambda i: (0, i, 0)),         # packed planes
        ],
        out_specs=pl.BlockSpec((3, tr, LANE), lambda i: (0, i, 0)),
        compiler_params=pltpu.CompilerParams(
            dimension_semantics=("parallel",)),
    )(params, packed_planes)


def lighting_texture_forward(points, normals, points_rgb,
                             light_location, camera_position,
                             ambient_color, diffuse_color, specular_color,
                             shininess=64, tr_max=TR_MAX):
    """points/normals/points_rgb: (P, 3) float32; returns shaded colors (P, 3)."""
    assert shininess == SHININESS, "shininess is baked into the kernel as a static constant"
    assert tr_max % CHUNK == 0, "tr_max must be a multiple of CHUNK"

    P = points.shape[0]
    steps, tr, nr_pad = _tile_plan(P, tr_max)
    P_pad = nr_pad * LANE

    # One fused pad + transpose for all three inputs (tail-only pad, no full
    # zero-fill + scatter), producing the packed channel-major (9, nr, 128) slab.
    stacked = jnp.stack([points, normals, points_rgb], axis=0).astype(jnp.float32)  # (3,P,3)
    stacked = jnp.pad(stacked, ((0, 0), (0, P_pad - P), (0, 0)))                    # (3,P_pad,3)
    planes = stacked.transpose(0, 2, 1).reshape(9, nr_pad, LANE)

    params = jnp.concatenate([
        light_location.astype(jnp.float32).reshape(-1),
        camera_position.astype(jnp.float32).reshape(-1),
        ambient_color.astype(jnp.float32).reshape(-1),
        diffuse_color.astype(jnp.float32).reshape(-1),
        specular_color.astype(jnp.float32).reshape(-1),
    ])
    params = jnp.pad(params, (0, 16 - params.shape[0]))  # f32[16] -> SMEM

    out_cm = lighting_texture_forward_planes(planes, params, tr)

    # TODO(synk): callers that can consume channel-major (3, nr, 128) output
    # should use lighting_texture_forward_planes directly and skip this transpose.
    return out_cm.reshape(3, P_pad).T[:P]


def lighting_texture_reference(points, normals, points_rgb,
                               light_location, camera_position,
                               ambient_color, diffuse_color, specular_color,
                               shininess=64):
    """Pure-JAX reference of apply_lighting + shading (for verification)."""
    def normalize(v):
        n = jnp.linalg.norm(v, axis=-1, keepdims=True)
        return v / jnp.maximum(n, EPS)

    n_hat = normalize(normals)
    d_hat = normalize(light_location[None, :] - points)
    cos_angle = jnp.sum(n_hat * d_hat, axis=-1)
    diffuse = diffuse_color[None, :] * jnp.maximum(cos_angle, 0.0)[:, None]

    mask = (cos_angle > 0.0).astype(jnp.float32)
    v_hat = normalize(camera_position[None, :] - points)
    reflect = -d_hat + 2.0 * cos_angle[:, None] * n_hat
    alpha = jnp.maximum(jnp.sum(v_hat * reflect, axis=-1), 0.0) * mask
    specular = specular_color[None, :] * (alpha ** shininess)[:, None]

    return points_rgb * (ambient_color[None, :] + diffuse) + specular


if __name__ == "__main__":
    key = jax.random.PRNGKey(0)

    # Deterministic "PointLights" / camera parameters (single light, single camera).
    light_location = jnp.array([2.0, 2.0, -2.0], jnp.float32)
    camera_position = jnp.array([0.0, 0.0, -5.0], jnp.float32)
    ambient_color = jnp.array([0.5, 0.5, 0.5], jnp.float32)
    diffuse_color = jnp.array([0.3, 0.3, 0.3], jnp.float32)
    specular_color = jnp.array([0.2, 0.2, 0.2], jnp.float32)

    # Case 1: small cloud (padding path, grid forced to 2 even steps).
    # Case 2: larger cloud with small tr_max -> multi-step grid, multi-chunk blocks.
    # Case 3: default tr_max -> tr > CHUNK exercises the in-kernel chunk loop.
    cases = [(200, TR_MAX), (5000, 32), (20000, TR_MAX)]
    for P, tr_max in cases:
        k1, k2, k3, key = jax.random.split(key, 4)
        points = jax.random.normal(k1, (P, 3), jnp.float32)
        normals = jax.random.normal(k2, (P, 3), jnp.float32)
        points_rgb = jax.random.uniform(k3, (P, 3), jnp.float32)  # features_packed()[:, :3]

        out = lighting_texture_forward(points, normals, points_rgb,
                                       light_location, camera_position,
                                       ambient_color, diffuse_color, specular_color,
                                       shininess=64, tr_max=tr_max)
        out = jax.block_until_ready(out)

        ref = lighting_texture_reference(points, normals, points_rgb,
                                         light_location, camera_position,
                                         ambient_color, diffuse_color, specular_color,
                                         shininess=64)
        assert out.shape == (P, 3)
        assert jnp.allclose(out, ref, rtol=1e-3, atol=1e-4), \
            f"kernel/reference mismatch (P={P}, tr_max={tr_max})"

    print("KERNEL_OK")
</pallas_src>

<mosaic_0001>
module attributes {stable_mosaic.version = 11 : i64} {
  func.func @lighting_kernel(%arg0: i32, %arg1: memref<16xf32, #tpu.memory_space<smem>>, %arg2: memref<9x32x128xf32, #tpu.memory_space<vmem>>, %arg3: memref<3x32x128xf32, #tpu.memory_space<vmem>>) attributes {dimension_semantics = [#tpu.dimension_semantics<parallel>], iteration_bounds = array<i64: 2>, scalar_prefetch = 0 : i64, scratch_operands = 0 : i64, tpu.core_type = #tpu.core_type<tc>, window_params = [{transform_indices = @transform_0, window_bounds = array<i64: 16>}, {transform_indices = @transform_1, window_bounds = array<i64: 9, 32, 128>}, {transform_indices = @transform_2, window_bounds = array<i64: 3, 32, 128>}]} {
    %c0 = arith.constant 0 : index
    %0 = memref.load %arg1[%c0] : memref<16xf32, #tpu.memory_space<smem>>
    %c1 = arith.constant 1 : index
    %1 = memref.load %arg1[%c1] : memref<16xf32, #tpu.memory_space<smem>>
    %c2 = arith.constant 2 : index
    %2 = memref.load %arg1[%c2] : memref<16xf32, #tpu.memory_space<smem>>
    %c3 = arith.constant 3 : index
    %3 = memref.load %arg1[%c3] : memref<16xf32, #tpu.memory_space<smem>>
    %c4 = arith.constant 4 : index
    %4 = memref.load %arg1[%c4] : memref<16xf32, #tpu.memory_space<smem>>
    %c5 = arith.constant 5 : index
    %5 = memref.load %arg1[%c5] : memref<16xf32, #tpu.memory_space<smem>>
    %c6 = arith.constant 6 : index
    %6 = memref.load %arg1[%c6] : memref<16xf32, #tpu.memory_space<smem>>
    %c7 = arith.constant 7 : index
    %7 = memref.load %arg1[%c7] : memref<16xf32, #tpu.memory_space<smem>>
    %c8 = arith.constant 8 : index
    %8 = memref.load %arg1[%c8] : memref<16xf32, #tpu.memory_space<smem>>
    %c9 = arith.constant 9 : index
    %9 = memref.load %arg1[%c9] : memref<16xf32, #tpu.memory_space<smem>>
    %c10 = arith.constant 10 : index
    %10 = memref.load %arg1[%c10] : memref<16xf32, #tpu.memory_space<smem>>
    %c11 = arith.constant 11 : index
    %11 = memref.load %arg1[%c11] : memref<16xf32, #tpu.memory_space<smem>>
    %c12 = arith.constant 12 : index
    %12 = memref.load %arg1[%c12] : memref<16xf32, #tpu.memory_space<smem>>
    %c13 = arith.constant 13 : index
    %13 = memref.load %arg1[%c13] : memref<16xf32, #tpu.memory_space<smem>>
    %c14 = arith.constant 14 : index
    %14 = memref.load %arg1[%c14] : memref<16xf32, #tpu.memory_space<smem>>
    %c0_i32 = arith.constant 0 : i32
    %c32_i32 = arith.constant 32 : i32
    %15 = arith.muli %c0_i32, %c32_i32 : i32
    %16 = tpu.assume_multiple %15, 32 : i32
    %c0_0 = arith.constant 0 : index
    %17 = arith.index_cast %16 : i32 to index
    %c0_1 = arith.constant 0 : index
    %18 = vector.load %arg2[%c0_0, %17, %c0_1] : memref<9x32x128xf32, #tpu.memory_space<vmem>>, vector<1x32x128xf32>
    %19 = vector.shape_cast %18 : vector<1x32x128xf32> to vector<32x128xf32>
    %c1_2 = arith.constant 1 : index
    %20 = arith.index_cast %16 : i32 to index
    %c0_3 = arith.constant 0 : index
    %21 = vector.load %arg2[%c1_2, %20, %c0_3] : memref<9x32x128xf32, #tpu.memory_space<vmem>>, vector<1x32x128xf32>
    %22 = vector.shape_cast %21 : vector<1x32x128xf32> to vector<32x128xf32>
    %c2_4 = arith.constant 2 : index
    %23 = arith.index_cast %16 : i32 to index
    %c0_5 = arith.constant 0 : index
    %24 = vector.load %arg2[%c2_4, %23, %c0_5] : memref<9x32x128xf32, #tpu.memory_space<vmem>>, vector<1x32x128xf32>
    %25 = vector.shape_cast %24 : vector<1x32x128xf32> to vector<32x128xf32>
    %c3_6 = arith.constant 3 : index
    %26 = arith.index_cast %16 : i32 to index
    %c0_7 = arith.constant 0 : index
    %27 = vector.load %arg2[%c3_6, %26, %c0_7] : memref<9x32x128xf32, #tpu.memory_space<vmem>>, vector<1x32x128xf32>
    %28 = vector.shape_cast %27 : vector<1x32x128xf32> to vector<32x128xf32>
    %c4_8 = arith.constant 4 : index
    %29 = arith.index_cast %16 : i32 to index
    %c0_9 = arith.constant 0 : index
    %30 = vector.load %arg2[%c4_8, %29, %c0_9] : memref<9x32x128xf32, #tpu.memory_space<vmem>>, vector<1x32x128xf32>
    %31 = vector.shape_cast %30 : vector<1x32x128xf32> to vector<32x128xf32>
    %c5_10 = arith.constant 5 : index
    %32 = arith.index_cast %16 : i32 to index
    %c0_11 = arith.constant 0 : index
    %33 = vector.load %arg2[%c5_10, %32, %c0_11] : memref<9x32x128xf32, #tpu.memory_space<vmem>>, vector<1x32x128xf32>
    %34 = vector.shape_cast %33 : vector<1x32x128xf32> to vector<32x128xf32>
    %35 = arith.mulf %28, %28 : vector<32x128xf32>
    %36 = arith.mulf %31, %31 : vector<32x128xf32>
    %37 = arith.addf %35, %36 : vector<32x128xf32>
    %38 = arith.mulf %34, %34 : vector<32x128xf32>
    %39 = arith.addf %37, %38 : vector<32x128xf32>
    %cst = arith.constant 9.99999996E-13 : f32
    %40 = vector.broadcast %cst : f32 to vector<32x128xf32>
    %41 = arith.maximumf %39, %40 : vector<32x128xf32>
    %42 = math.rsqrt %41 : vector<32x128xf32>
    %43 = arith.mulf %28, %42 : vector<32x128xf32>
    %44 = arith.mulf %31, %42 : vector<32x128xf32>
    %45 = arith.mulf %34, %42 : vector<32x128xf32>
    %46 = vector.broadcast %0 : f32 to vector<32x128xf32>
    %47 = arith.subf %46, %19 : vector<32x128xf32>
    %48 = vector.broadcast %1 : f32 to vector<32x128xf32>
    %49 = arith.subf %48, %22 : vector<32x128xf32>
    %50 = vector.broadcast %2 : f32 to vector<32x128xf32>
    %51 = arith.subf %50, %25 : vector<32x128xf32>
    %52 = arith.mulf %47, %47 : vector<32x128xf32>
    %53 = arith.mulf %49, %49 : vector<32x128xf32>
    %54 = arith.addf %52, %53 : vector<32x128xf32>
    %55 = arith.mulf %51, %51 : vector<32x128xf32>
    %56 = arith.addf %54, %55 : vector<32x128xf32>
    %cst_12 = arith.constant 9.99999996E-13 : f32
    %57 = vector.broadcast %cst_12 : f32 to vector<32x128xf32>
    %58 = arith.maximumf %56, %57 : vector<32x128xf32>
    %59 = math.rsqrt %58 : vector<32x128xf32>
    %60 = arith.mulf %47, %59 : vector<32x128xf32>
    %61 = arith.mulf %49, %59 : vector<32x128xf32>
    %62 = arith.mulf %51, %59 : vector<32x128xf32>
    %63 = arith.mulf %43, %60 : vector<32x128xf32>
    %64 = arith.mulf %44, %61 : vector<32x128xf32>
    %65 = arith.addf %63, %64 : vector<32x128xf32>
    %66 = arith.mulf %45, %62 : vector<32x128xf32>
    %67 = arith.addf %65, %66 : vector<32x128xf32>
    %cst_13 = arith.constant 0.000000e+00 : f32
    %68 = vector.broadcast %cst_13 : f32 to vector<32x128xf32>
    %69 = arith.maximumf %67, %68 : vector<32x128xf32>
    %70 = vector.broadcast %3 : f32 to vector<32x128xf32>
    %71 = arith.subf %70, %19 : vector<32x128xf32>
    %72 = vector.broadcast %4 : f32 to vector<32x128xf32>
    %73 = arith.subf %72, %22 : vector<32x128xf32>
    %74 = vector.broadcast %5 : f32 to vector<32x128xf32>
    %75 = arith.subf %74, %25 : vector<32x128xf32>
    %76 = arith.mulf %71, %71 : vector<32x128xf32>
    %77 = arith.mulf %73, %73 : vector<32x128xf32>
    %78 = arith.addf %76, %77 : vector<32x128xf32>
    %79 = arith.mulf %75, %75 : vector<32x128xf32>
    %80 = arith.addf %78, %79 : vector<32x128xf32>
    %cst_14 = arith.constant 9.99999996E-13 : f32
    %81 = vector.broadcast %cst_14 : f32 to vector<32x128xf32>
    %82 = arith.maximumf %80, %81 : vector<32x128xf32>
    %83 = math.rsqrt %82 : vector<32x128xf32>
    %84 = arith.mulf %71, %83 : vector<32x128xf32>
    %85 = arith.mulf %73, %83 : vector<32x128xf32>
    %86 = arith.mulf %75, %83 : vector<32x128xf32>
    %cst_15 = arith.constant 2.000000e+00 : f32
    %87 = vector.broadcast %cst_15 : f32 to vector<32x128xf32>
    %88 = arith.mulf %87, %67 : vector<32x128xf32>
    %89 = arith.mulf %88, %43 : vector<32x128xf32>
    %90 = arith.subf %89, %60 : vector<32x128xf32>
    %91 = arith.mulf %88, %44 : vector<32x128xf32>
    %92 = arith.subf %91, %61 : vector<32x128xf32>
    %93 = arith.mulf %88, %45 : vector<32x128xf32>
    %94 = arith.subf %93, %62 : vector<32x128xf32>
    %95 = arith.mulf %84, %90 : vector<32x128xf32>
    %96 = arith.mulf %85, %92 : vector<32x128xf32>
    %97 = arith.addf %95, %96 : vector<32x128xf32>
    %98 = arith.mulf %86, %94 : vector<32x128xf32>
    %99 = arith.addf %97, %98 : vector<32x128xf32>
    %cst_16 = arith.constant 0.000000e+00 : f32
    %100 = vector.broadcast %cst_16 : f32 to vector<32x128xf32>
    %101 = arith.cmpf ogt, %67, %100 : vector<32x128xf32>
    %cst_17 = arith.constant 0.000000e+00 : f32
    %102 = vector.broadcast %cst_17 : f32 to vector<32x128xf32>
    %103 = arith.maximumf %99, %102 : vector<32x128xf32>
    %cst_18 = arith.constant 0.000000e+00 : f32
    %104 = vector.broadcast %cst_18 : f32 to vector<32x128xf32>
    %105 = arith.select %101, %103, %104 : vector<32x128xi1>, vector<32x128xf32>
    %106 = arith.mulf %105, %105 : vector<32x128xf32>
    %107 = arith.mulf %106, %106 : vector<32x128xf32>
    %108 = arith.mulf %107, %107 : vector<32x128xf32>
    %109 = arith.mulf %108, %108 : vector<32x128xf32>
    %110 = arith.mulf %109, %109 : vector<32x128xf32>
    %111 = arith.mulf %110, %110 : vector<32x128xf32>
    %c6_19 = arith.constant 6 : index
    %112 = arith.index_cast %16 : i32 to index
    %c0_20 = arith.constant 0 : index
    %113 = vector.load %arg2[%c6_19, %112, %c0_20] : memref<9x32x128xf32, #tpu.memory_space<vmem>>, vector<1x32x128xf32>
    %114 = vector.shape_cast %113 : vector<1x32x128xf32> to vector<32x128xf32>
    %115 = vector.broadcast %9 : f32 to vector<32x128xf32>
    %116 = arith.mulf %115, %69 : vector<32x128xf32>
    %117 = vector.broadcast %6 : f32 to vector<32x128xf32>
    %118 = arith.addf %117, %116 : vector<32x128xf32>
    %119 = arith.mulf %114, %118 : vector<32x128xf32>
    %120 = vector.broadcast %12 : f32 to vector<32x128xf32>
    %121 = arith.mulf %120, %111 : vector<32x128xf32>
    %122 = arith.addf %119, %121 : vector<32x128xf32>
    %c0_21 = arith.constant 0 : index
    %123 = arith.index_cast %16 : i32 to index
    %c0_22 = arith.constant 0 : index
    %124 = vector.load %arg3[%c0_21, %123, %c0_22] : memref<3x32x128xf32, #tpu.memory_space<vmem>>, vector<1x32x128xf32>
    %125 = vector.shape_cast %124 : vector<1x32x128xf32> to vector<32x128xf32>
    %126 = vector.shape_cast %122 : vector<32x128xf32> to vector<1x32x128xf32>
    tpu.vector_store %arg3[%c0_21, %123, %c0_22], %126 {strides = array<i32>} : memref<3x32x128xf32, #tpu.memory_space<vmem>>, vector<1x32x128xf32>,
    %c7_23 = arith.constant 7 : index
    %127 = arith.index_cast %16 : i32 to index
    %c0_24 = arith.constant 0 : index
    %128 = vector.load %arg2[%c7_23, %127, %c0_24] : memref<9x32x128xf32, #tpu.memory_space<vmem>>, vector<1x32x128xf32>
    %129 = vector.shape_cast %128 : vector<1x32x128xf32> to vector<32x128xf32>
    %130 = vector.broadcast %10 : f32 to vector<32x128xf32>
    %131 = arith.mulf %130, %69 : vector<32x128xf32>
    %132 = vector.broadcast %7 : f32 to vector<32x128xf32>
    %133 = arith.addf %132, %131 : vector<32x128xf32>
    %134 = arith.mulf %129, %133 : vector<32x128xf32>
    %135 = vector.broadcast %13 : f32 to vector<32x128xf32>
    %136 = arith.mulf %135, %111 : vector<32x128xf32>
    %137 = arith.addf %134, %136 : vector<32x128xf32>
    %c1_25 = arith.constant 1 : index
    %138 = arith.index_cast %16 : i32 to index
    %c0_26 = arith.constant 0 : index
    %139 = vector.load %arg3[%c1_25, %138, %c0_26] : memref<3x32x128xf32, #tpu.memory_space<vmem>>, vector<1x32x128xf32>
    %140 = vector.shape_cast %139 : vector<1x32x128xf32> to vector<32x128xf32>
    %141 = vector.shape_cast %137 : vector<32x128xf32> to vector<1x32x128xf32>
    tpu.vector_store %arg3[%c1_25, %138, %c0_26], %141 {strides = array<i32>} : memref<3x32x128xf32, #tpu.memory_space<vmem>>, vector<1x32x128xf32>,
    %c8_27 = arith.constant 8 : index
    %142 = arith.index_cast %16 : i32 to index
    %c0_28 = arith.constant 0 : index
    %143 = vector.load %arg2[%c8_27, %142, %c0_28] : memref<9x32x128xf32, #tpu.memory_space<vmem>>, vector<1x32x128xf32>
    %144 = vector.shape_cast %143 : vector<1x32x128xf32> to vector<32x128xf32>
    %145 = vector.broadcast %11 : f32 to vector<32x128xf32>
    %146 = arith.mulf %145, %69 : vector<32x128xf32>
    %147 = vector.broadcast %8 : f32 to vector<32x128xf32>
    %148 = arith.addf %147, %146 : vector<32x128xf32>
    %149 = arith.mulf %144, %148 : vector<32x128xf32>
    %150 = vector.broadcast %14 : f32 to vector<32x128xf32>
    %151 = arith.mulf %150, %111 : vector<32x128xf32>
    %152 = arith.addf %149, %151 : vector<32x128xf32>
    %c2_29 = arith.constant 2 : index
    %153 = arith.index_cast %16 : i32 to index
    %c0_30 = arith.constant 0 : index
    %154 = vector.load %arg3[%c2_29, %153, %c0_30] : memref<3x32x128xf32, #tpu.memory_space<vmem>>, vector<1x32x128xf32>
    %155 = vector.shape_cast %154 : vector<1x32x128xf32> to vector<32x128xf32>
    %156 = vector.shape_cast %152 : vector<32x128xf32> to vector<1x32x128xf32>
    tpu.vector_store %arg3[%c2_29, %153, %c0_30], %156 {strides = array<i32>} : memref<3x32x128xf32, #tpu.memory_space<vmem>>, vector<1x32x128xf32>,
    %c1_i32 = arith.constant 1 : i32
    return
  }
  func.func @transform_0(%arg0: i32) -> i32 {
    %c0_i32 = arith.constant 0 : i32
    %c0_i32_0 = arith.constant 0 : i32
    return %c0_i32 : i32
  }
  func.func @transform_1(%arg0: i32) -> (i32, i32, i32) {
    %c0_i32 = arith.constant 0 : i32
    %c0_i32_0 = arith.constant 0 : i32
    %c0_i32_1 = arith.constant 0 : i32
    return %c0_i32, %arg0, %c0_i32_0 : i32, i32, i32
  }
  func.func @transform_2(%arg0: i32) -> (i32, i32, i32) {
    %c0_i32 = arith.constant 0 : i32
    %c0_i32_0 = arith.constant 0 : i32
    %c0_i32_1 = arith.constant 0 : i32
    return %c0_i32, %arg0, %c0_i32_0 : i32, i32, i32
  }
}

</mosaic_0001>

<bundles_post_ra>
// kernel: tpu_custom_call.1
= control target key start
LH: loop header
LB: loop body
LE: loop exit
PB: predicated region body
PF: predicated region fallthrough
CT: control target
= control target key end

     0   :  { %7 = vsyncpa [#allocation5], 0  ;;  %s1631_s0 = inlined_call_operand.hbm [shape: f32[16], index: 0, kind: input, shape index: {}]   ;;  %s1632_s1 = inlined_call_operand.hbm [shape: f32[9,64,128], index: 1, kind: input, shape index: {}]   ;;  %s1633_s2 = inlined_call_operand.hbm [shape: f32[3,64,128], index: 2, kind: output, shape index: {}]  }
   0x1   :  { %8 = vsyncpa [#allocation3], 0 }
   0x2   :  { %10 = vsyncpa [#allocation3 + $0x1], 0 }
   0x3   :  { %11 = vsyncpa [#allocation4], 0 }
   0x4   :  { %13 = vsyncpa [#allocation4 + $0x1], 0  ;;  %s1008_s9 = smov 0   ;;  %s1010_s10 = smov 0  }
   0x5   :  { %s1012_s11 = smov 0   ;;  %s1014_s12 = smov 0  }
   0x6 LB: > { %s1029_s13 = sadd.s32 4294967295, %s977_s12   ;;  %s747_s14 = sadd.s32 4294967294, %s977_s12   ;;  %s977_s12 = sphi %s1014_s12, %s1642_s12   ;;  %s973_s11 = sphi %s1012_s11, %s1641_s11   ;;  %s969_s10 = sphi %s1010_s10, %s1640_s10   ;;  %s965_s9 = sphi %s1008_s9, %s1639_s9  }
   0x7   : > { %s1033_s15 = sadd.s32 1, %s977_s12   ;;  %s47_s16 = sadd.s32 1, %s973_s11 }
   0x8   : > { %s44_s17 = ssub.s32 %s977_s12, %s1033_s15  ;;  %p54_p0 = scmp.ne.s32.totalorder %s973_s11, %s969_s10 }
   0x9   : > { %p45_p1 = scmp.eq.s32.totalorder %s44_s17, 0  ;;  %p55_p2 = scmp.eq.s32.totalorder %s977_s12, 0 }
   0xa   : > { %p60_p3 = scmp.ne.s32.totalorder %s969_s10, %s965_s9  ;;  %p61_p4 = scmp.eq.s32.totalorder %s1029_s13, 0 }
   0xb   : > { %s1045_s18 = scalar_select %p45_p1, %s973_s11, %s47_s16  }
   0xc   : > { %p1047_p5 = por %p55_p2, %p54_p0  ;;  %p1053_p6 = por %p61_p4, %p60_p3 }
   0xd   : > { %p84_p7 = scmp.eq.s32.totalorder %s1029_s13, 1  ;;  %p90_p8 = scmp.eq.s32.totalorder %s747_s14, 1 }
   0xe   : > { %p748_p9 = scmp.ge.s32.totalorder %s977_s12, 1  ;;  %p97_p10 = scmp.lt.s32.totalorder %s977_s12, 3 }
   0xf   : > { %p1060_p11 = por %p84_p7, %p54_p0  ;;  %p1064_p12 = por %p90_p8, %p60_p3 }
  0x10   : > { %p1068_p13 = pnand %p748_p9, %p97_p10  ;;  %s922_s26 = scalar_lea.hbm %s1631_s0, 16 }
  0x11   : > { %p923_p0 = scmp.ne.s32.totalorder %s1631_s0, %s922_s26  ;;  %p929_p9 = scmp.lt.u32.totalorder %s922_s26, %s1631_s0 }
  0x12   : > { %p841_p1 = pneg %p1068_p13 }
  0x14   : > { %p842_p2 = pnand %p841_p1, %p61_p4 }
  0x16   : > { %p924_p3 = pneg %p842_p2 }
  0x18   : > { %p925_p7 = pnand %p924_p3, %p923_p0 }
  0x1a   : > { %p926_p8 = pneg %p925_p7 }
  0x1c   : > { %p931_p10 = pnand %p929_p9, %p926_p8 }
  0x1e   : > { %934 = shalt.err (!%p931_p10)
}
  0x1f   : > { %s979_s3 = smov [#allocation2]   ;;  %p750_p1 = scmp.ge.s32.totalorder %s977_s12, 2 }
  0x20   : > { %844 = dma.hbm_to_smem (!%p842_p2), %s1631_s0, 16, %s979_s3, [#allocation5]  }
  0x21   : > { %115 = sbr.rel (%p750_p1) target bundleno = 54 (0x36), region = 20 }
  0x28   : > { %s119_s6 = sand.u32 1, %s973_s11   ;;  %s815_s8 = sshll.u32 %s977_s12, 9 }
  0x29   : > { %s817_s7 = smul.u32 288, %s119_s6  ;;  %s980_s14 = smov 1024  }
  0x2a   : > { %823 = sst [smem:[#allocation9]] (%p1047_p5), %s980_s14  ;;  %s129_s25 = scalar_lea.hbm %s1632_s1, %s815_s8 }
  0x2b   : > { %s822_s16 = scalar_select %p1047_p5, [#allocation0], [#allocation12] }
  0x2c   : > { %s123_s27 = scalar_lea.vmem [#allocation6], %s817_s7  ;;  %s981_s29 = smov 512  }
  0x2d   : > { %s134_s26 = sld [smem:[%s822_s16]]   ;;  %s142_s28 = sshll.u32 %s123_s27, 4  ;;  %s143_s28 = int_to_ptr.vmem [resolvable:$true] %s142_s28 }
  0x2e   : > { %824 = sst [smem:[#allocation9 + $0x1]] (%p1047_p5), %s981_s29  ;;  %s982_s30 = smov 4  }
  0x2f   : > { %825 = sst [smem:[#allocation9 + $0x2]] (%p1047_p5), %s982_s30  ;;  %s983_s3 = smov 128  }
  0x30   : > { %826 = sst [smem:[#allocation9 + $0x3]] (%p1047_p5), %s983_s3  ;;  %s984_s4 = smov 8  }
  0x31   : > { %827 = sst [smem:[#allocation9 + $0x4]] (%p1047_p5), %s983_s3  ;;  %s120_s7 = scalar_lea.sflag [#allocation3], %s119_s6 }
  0x32   : > { %828 = sst [smem:[#allocation9 + $0x5]] (%p1047_p5), %s984_s4  ;;  %s985_s14 = smov [#allocation8]  }
  0x33   : > { %s753_s5 = sshll.u32 %s134_s26, 26 }
  0x34   : > { %s754_s8 = sadd.s32 134217728, %s753_s5 }
  0x35   : > { %829 = dma.general (%p1047_p5), %s129_s25, 4608, %s143_s28, %s120_s7, %s985_s14, [#allocation9], %s754_s8, 0  }
  0x36 PF: > { %167 = sbr.rel (%p1068_p13) target bundleno = 181 (0xb5), region = 28 }
  0x3d   : > { %952 = dma.done.wait (%p61_p4), [#allocation5], 16  }
  0x3e   : > { %954 = vsyncadd (%p61_p4), [#allocation5], 4294967280  ;;  %s1119_s16 = sand.u32 1, %s969_s10  }
  0x3f   : > { %s818_s6 = smul.u32 288, %s1119_s16  ;;  %s174_s17 = scalar_lea.sflag [#allocation3], %s1119_s16 }
  0x41   : > { %s1123_s19 = scalar_lea.vmem [#allocation6], %s818_s6 }
  0x42   : > { %956 = dma.done.wait (%p1053_p6), %s174_s17, 4608  }
  0x43   : > { %958 = vsyncadd (%p1053_p6), %s174_s17, 4294962688 }
  0x44   : > { %182 = sfence }
  0x45   : > { %s201_s23 = sld [smem:[#allocation2]]  ;;  %s757_s24 = sld [smem:[#allocation2 + $0x1]]  ;;  %v1130_v0 = vld [vmem:[%s1123_s19 + $0x60] sm:$0xff]  ;;  %v1146_v8 = vld [vmem:[%s1123_s19 + $0x68] sm:$0xff]  ;;  %v1224_v49 = vld [vmem:[%s1123_s19 + $0x70] sm:$0xff] }
  0x46   : > { %s758_s25 = sld [smem:[#allocation2 + $0x2]]  ;;  %v1133_v1 = vld [vmem:[%s1123_s19 + $0x80] sm:$0xff]  ;;  %s759_s26 = sld [smem:[#allocation2 + $0x3]]  ;;  %v250_v3 = vmul.f32 %v1130_v0, %v1130_v0  ;;  %v1149_v9 = vld [vmem:[%s1123_s19 + $0x88] sm:$0xff]  ;;  %v251_v13 = vmul.f32 %v1146_v8, %v1146_v8  ;;  %v1236_v54 = vld [vmem:[%s1123_s19 + $0x90] sm:$0xff] }
  0x47   : > { %v1136_v2 = vld [vmem:[%s1123_s19 + $0xa0] sm:$0xff]  ;;  %v254_v4 = vmul.f32 %v1133_v1, %v1133_v1  ;;  %s760_s20 = sld [smem:[#allocation2 + $0x4]]  ;;  %s761_s27 = sld [smem:[#allocation2 + $0x5]]  ;;  %v1154_v12 = vld [vmem:[%s1123_s19 + $0xa8] sm:$0xff]  ;;  %v255_v14 = vmul.f32 %v1149_v9, %v1149_v9  ;;  %v218_v58 = vld [vmem:[%s1123_s19 + $0x10] sm:$0xff] }
  0x48   : > { %v262_v5 = vmul.f32 %v1136_v2, %v1136_v2  ;;  %v216_v6 = vld [vmem:[%s1123_s19] sm:$0xff]  ;;  %v263_v17 = vmul.f32 %v1154_v12, %v1154_v12  ;;  %v217_v33 = vld [vmem:[%s1123_s19 + $0x8] sm:$0xff]  ;;  %s1205_s28 = sld [smem:[#allocation2 + $0x6]]  ;;  %s1207_s29 = sld [smem:[#allocation2 + $0x9]]  ;;  %v1243_v59 = vld [vmem:[%s1123_s19 + $0xb0] sm:$0xff] }
  0x49   : > { %v258_v7 = vadd.f32 %v254_v4, %v250_v3  ;;  %v771_v10 = vld [vmem:[%s1123_s19 + $0x20] sm:$0xff]  ;;  %v259_v21 = vadd.f32 %v255_v14, %v251_v13  ;;  %v772_v34 = vld [vmem:[%s1123_s19 + $0x28] sm:$0xff]  ;;  %v773_v63 = vld [vmem:[%s1123_s19 + $0x30] sm:$0xff]  ;;  %v252_v4 = vmul.f32 %v1224_v49, %v1224_v49  ;;  %v264_v13 = vmul.f32 %v1243_v59, %v1243_v59  ;;  %s1274_s30 = sld [smem:[#allocation2 + $0xc]]  ;;  %s1427_s3 = sld [smem:[#allocation2 + $0xa]] }
  0x4a   : > { %v775_v11 = vld [vmem:[%s1123_s19 + $0x40] sm:$0xff]  ;;  %v776_v35 = vld [vmem:[%s1123_s19 + $0x48] sm:$0xff]  ;;  %v777_v3 = vld [vmem:[%s1123_s19 + $0x50] sm:$0xff]  ;;  %s1448_s4 = sld [smem:[#allocation2 + $0x7]]  ;;  %s1459_s5 = sld [smem:[#allocation2 + $0xd]] }
  0x4b   : > { %v266_v15 = vadd.f32 %v262_v5, %v258_v7  ;;  %v1160_v16 = vstv %s201_s23  ;;  %v1167_v19 = vstv %s757_s24  ;;  %v267_v40 = vadd.f32 %v263_v17, %v259_v21  ;;  %s1461_s8 = sld [smem:[#allocation2 + $0xb]]  ;;  %s1486_s7 = sld [smem:[#allocation2 + $0x8]] }
  0x4c   : > { %v1165_v18 = vsub.f32 %v1160_v16, %v216_v6  ;;  %v1169_v20 = vstv %s758_s25  ;;  %v1172_v23 = vsub.f32 %v1167_v19, %v771_v10  ;;  %v1177_v25 = vstv %s759_s26  ;;  %s819_s14 = smul.u32 96, %s1119_s16  ;;  %s1492_s6 = sld [smem:[#allocation2 + $0xe]] }
  0x4d   : > { %v270_v22 = vmax.f32 %v266_v15, 1e-12  ;;  %v1175_v24 = vsub.f32 %v1169_v20, %v775_v11  ;;  %v1182_v27 = vsub.f32 %v1177_v25, %v216_v6  ;;  %v1184_v28 = vstv %s760_s20  ;;  %s610_s23 = scalar_lea.sflag [#allocation4], %s1119_s16 }
  0x4e   : > { %v305_v26 = vmul.f32 %v1165_v18, %v1165_v18  ;;  %v1186_v29 = vstv %s761_s27  ;;  %v309_v30 = vmul.f32 %v1172_v23, %v1172_v23  ;;  %v1193_v32 = vsub.f32 %v1184_v28, %v771_v10  ;;  %s1530_s17 = scalar_lea.vmem [#allocation7], %s819_s14 }
  0x4f   : > { %v317_v31 = vmul.f32 %v1175_v24, %v1175_v24  ;;  %v1199_v36 = vsub.f32 %v1186_v29, %v775_v11  ;;  %v384_v37 = vmul.f32 %v1182_v27, %v1182_v27  ;;  %898 = vrsqrt.f32 %v270_v22 }
  0x50   : > { %v313_v38 = vadd.f32 %v309_v30, %v305_v26  ;;  %v388_v39 = vmul.f32 %v1193_v32, %v1193_v32  ;;  %v1212_v42 = vsub.f32 %v1160_v16, %v217_v33  ;;  %v1215_v43 = vsub.f32 %v1167_v19, %v772_v34 }
  0x51   : > { %v396_v41 = vmul.f32 %v1199_v36, %v1199_v36  ;;  %v1218_v44 = vsub.f32 %v1169_v20, %v776_v35  ;;  %v271_v47 = vmax.f32 %v267_v40, 1e-12  ;;  %v1221_v48 = vsub.f32 %v1177_v25, %v217_v33 }
  0x52   : > { %v321_v45 = vadd.f32 %v317_v31, %v313_v38  ;;  %v392_v46 = vadd.f32 %v388_v39, %v384_v37  ;;  %v306_v50 = vmul.f32 %v1212_v42, %v1212_v42  ;;  %v310_v51 = vmul.f32 %v1215_v43, %v1215_v43  ;;  %v1281_v38 = vld [vmem:[%s1123_s19 + $0x78] sm:$0xff] }
  0x53   : > { %v318_v52 = vmul.f32 %v1218_v44, %v1218_v44  ;;  %v1233_v53 = vsub.f32 %v1184_v28, %v772_v34  ;;  %900 = vrsqrt.f32 %v271_v47  ;;  %v1239_v57 = vsub.f32 %v1186_v29, %v776_v35  ;;  %v1284_v39 = vld [vmem:[%s1123_s19 + $0x98] sm:$0xff] }
  0x54   : > { %v325_v55 = vmax.f32 %v321_v45, 1e-12  ;;  %v400_v56 = vadd.f32 %v396_v41, %v392_v46  ;;  %v314_v60 = vadd.f32 %v310_v51, %v306_v50  ;;  %v385_v61 = vmul.f32 %v1221_v48, %v1221_v48  ;;  %v1295_v46 = vld [vmem:[%s1123_s19 + $0xb8] sm:$0xff] }
  0x55   : > { %v389_v62 = vmul.f32 %v1233_v53, %v1233_v53  ;;  %v397_v6 = vmul.f32 %v1239_v57, %v1239_v57  ;;  %v256_v7 = vmul.f32 %v1236_v54, %v1236_v54  ;;  %v1260_v14 = vsub.f32 %v1160_v16, %v218_v58 }
  0x56   : > { %902 = vrsqrt.f32 %v325_v55  ;;  %v404_v5 = vmax.f32 %v400_v56, 1e-12  ;;  %v322_v10 = vadd.f32 %v318_v52, %v314_v60  ;;  %v1263_v17 = vsub.f32 %v1167_v19, %v773_v63 }
  0x57   : > { %v393_v11 = vadd.f32 %v389_v62, %v385_v61  ;;  %v260_v15 = vadd.f32 %v256_v7, %v252_v4  ;;  %v1266_v21 = vsub.f32 %v1169_v20, %v777_v3  ;;  %v1269_v22 = vstv %s1207_s29  ;;  %v774_v4 = vld [vmem:[%s1123_s19 + $0x38] sm:$0xff] }
  0x58   : > { %904 = vrsqrt.f32 %v404_v5  ;;  %v1272_v26 = vstv %s1205_s28  ;;  %v326_v30 = vmax.f32 %v322_v10, 1e-12  ;;  %v307_v35 = vmul.f32 %v1260_v14, %v1260_v14 }
  0x59   : > { %v899_v31 = vpop.eup %898  ;;  %v401_v33 = vadd.f32 %v397_v6, %v393_v11  ;;  %v268_v34 = vadd.f32 %v264_v13, %v260_v15  ;;  %v311_v37 = vmul.f32 %v1263_v17, %v1263_v17  ;;  %v319_v40 = vmul.f32 %v1266_v21, %v1266_v21 }
  0x5a   : > { %906 = vrsqrt.f32 %v326_v30  ;;  %v1289_v41 = vsub.f32 %v1177_v25, %v218_v58  ;;  %v1292_v45 = vsub.f32 %v1184_v28, %v773_v63  ;;  %v1298_v52 = vsub.f32 %v1186_v29, %v777_v3  ;;  %v219_v58 = vld [vmem:[%s1123_s19 + $0x18] sm:$0xff] }
  0x5b   : > { %v405_v47 = vmax.f32 %v401_v33, 1e-12  ;;  %v272_v50 = vmax.f32 %v268_v34, 1e-12  ;;  %v315_v51 = vadd.f32 %v311_v37, %v307_v35  ;;  %v253_v60 = vmul.f32 %v1281_v38, %v1281_v38  ;;  %v1318_v30 = vld [vmem:[%s1123_s19 + $0x58] sm:$0xff] }
  0x5c   : > { %v386_v55 = vmul.f32 %v1289_v41, %v1289_v41  ;;  %v390_v56 = vmul.f32 %v1292_v45, %v1292_v45  ;;  %v257_v61 = vmul.f32 %v1284_v39, %v1284_v39  ;;  %v398_v3 = vmul.f32 %v1298_v52, %v1298_v52 }
  0x5d   : > { %v901_v62 = vpop.eup %900  ;;  %908 = vrsqrt.f32 %v405_v47  ;;  %v323_v63 = vadd.f32 %v319_v40, %v315_v51  ;;  %v265_v5 = vmul.f32 %v1295_v46, %v1295_v46  ;;  %v278_v6 = vmul.f32 %v899_v31, %v1130_v0 }
  0x5e   : > { %v282_v7 = vmul.f32 %v899_v31, %v1133_v1  ;;  %v286_v10 = vmul.f32 %v899_v31, %v1136_v2  ;;  %910 = vrsqrt.f32 %v272_v50  ;;  %v394_v15 = vadd.f32 %v390_v56, %v386_v55 }
  0x5f   : > { %v327_v13 = vmax.f32 %v323_v63, 1e-12  ;;  %v261_v33 = vadd.f32 %v257_v61, %v253_v60  ;;  %v1321_v34 = vsub.f32 %v1160_v16, %v219_v58  ;;  %v1333_v1 = vsub.f32 %v1167_v19, %v774_v4 }
  0x60   : > { %v903_v11 = vpop.eup %902  ;;  %v1336_v2 = vstv %s1274_s30  ;;  %v402_v31 = vadd.f32 %v398_v3, %v394_v15  ;;  %v283_v19 = vmul.f32 %v901_v62, %v1149_v9  ;;  %v287_v51 = vmul.f32 %v901_v62, %v1154_v12 }
  0x61   : > { %v1324_v35 = vmul.f32 %v903_v11, %v1165_v18  ;;  %v1327_v37 = vmul.f32 %v903_v11, %v1172_v23  ;;  %v1330_v0 = vmul.f32 %v903_v11, %v1175_v24  ;;  %912 = vrsqrt.f32 %v327_v13 }
  0x62   : > { %v269_v40 = vadd.f32 %v265_v5, %v261_v33  ;;  %v905_v47 = vpop.eup %904  ;;  %v1343_v23 = vsub.f32 %v1169_v20, %v1318_v30  ;;  %v279_v24 = vmul.f32 %v901_v62, %v1146_v8  ;;  %v406_v55 = vmax.f32 %v402_v31, 1e-12 }
  0x63   : > { %v345_v16 = vmul.f32 %v1324_v35, %v278_v6  ;;  %v349_v18 = vmul.f32 %v1327_v37, %v282_v7  ;;  %v357_v50 = vmul.f32 %v1330_v0, %v286_v10  ;;  %v308_v63 = vmul.f32 %v1321_v34, %v1321_v34 }
  0x64   : > { %v907_v56 = vpop.eup %906  ;;  %v273_v61 = vmax.f32 %v269_v40, 1e-12  ;;  %v312_v3 = vmul.f32 %v1333_v1, %v1333_v1  ;;  %v412_v5 = vmul.f32 %v905_v47, %v1182_v27  ;;  %v416_v62 = vmul.f32 %v905_v47, %v1193_v32 }
  0x65   : > { %v353_v60 = vadd.f32 %v349_v18, %v345_v16  ;;  %v1354_v20 = vmul.f32 %v907_v56, %v1212_v42  ;;  %v1357_v8 = vmul.f32 %v907_v56, %v1215_v43  ;;  %v1360_v9 = vmul.f32 %v907_v56, %v1218_v44 }
  0x66   : > { %v420_v11 = vmul.f32 %v905_v47, %v1199_v36  ;;  %v320_v13 = vmul.f32 %v1343_v23, %v1343_v23  ;;  %914 = vrsqrt.f32 %v406_v55  ;;  %v316_v32 = vadd.f32 %v312_v3, %v308_v63 }
  0x67   : > { %v1362_v12 = vadd.f32 %v357_v50, %v353_v60  ;;  %v909_v15 = vpop.eup %908  ;;  %v346_v27 = vmul.f32 %v1354_v20, %v279_v24  ;;  %v350_v42 = vmul.f32 %v1357_v8, %v283_v19  ;;  %v358_v43 = vmul.f32 %v1360_v9, %v287_v51 }
  0x68   : > { %v911_v33 = vpop.eup %910  ;;  %916 = vrsqrt.f32 %v273_v61  ;;  %v413_v40 = vmul.f32 %v909_v15, %v1221_v48  ;;  %v1377_v47 = vsub.f32 %v1177_v25, %v219_v58  ;;  %v1380_v16 = vsub.f32 %v1184_v28, %v774_v4 }
  0x69   : > { %v1372_v44 = vmax.f32 %v1362_v12, 0.0  ;;  %v424_v31 = vmul.f32 2.0, %v1362_v12  ;;  %v354_v36 = vadd.f32 %v350_v42, %v346_v27  ;;  %vm472_vm0 = vcmp.gt.f32.partialorder %v1362_v12, 0.0 }
  0x6a   : > { %v417_v63 = vmul.f32 %v909_v15, %v1233_v53  ;;  %v421_v48 = vmul.f32 %v909_v15, %v1239_v57  ;;  %v1390_v25 = vmul.f32 %v911_v33, %v1224_v49  ;;  %v288_v53 = vmul.f32 %v911_v33, %v1243_v59 }
  0x6b   : > { %v428_v18 = vmul.f32 %v424_v31, %v278_v6  ;;  %v436_v50 = vmul.f32 %v424_v31, %v282_v7  ;;  %v444_v55 = vmul.f32 %v424_v31, %v286_v10  ;;  %v515_v56 = vmul.f32 %v1269_v22, %v1372_v44  ;;  %v913_v60 = vpop.eup %912 }
  0x6c   : > { %v1385_v61 = vadd.f32 %v358_v43, %v354_v36  ;;  %v1396_v6 = vmul.f32 %v911_v33, %v1236_v54  ;;  %v1404_v49 = vmul.f32 %v913_v60, %v1260_v14  ;;  %v1410_v43 = vmul.f32 %v913_v60, %v1263_v17  ;;  %v792_v17 = vld [vmem:[%s1123_s19 + $0xc8] sm:$0xff] }
  0x6d   : > { %v432_v28 = vsub.f32 %v428_v18, %v1324_v35  ;;  %v440_v58 = vsub.f32 %v436_v50, %v1327_v37  ;;  %v448_v4 = vsub.f32 %v444_v55, %v1330_v0  ;;  %v520_v37 = vadd.f32 %v1272_v26, %v515_v56 }
  0x6e   : > { %v1399_v7 = vmax.f32 %v1385_v61, 0.0  ;;  %v425_v10 = vmul.f32 2.0, %v1385_v61  ;;  %v1413_v59 = vmul.f32 %v913_v60, %v1266_v21  ;;  %v347_v14 = vmul.f32 %v1404_v49, %v1390_v25 }
  0x6f   : > { %v452_v57 = vmul.f32 %v432_v28, %v412_v5  ;;  %v456_v35 = vmul.f32 %v440_v58, %v416_v62  ;;  %v464_v3 = vmul.f32 %v448_v4, %v420_v11  ;;  %v791_v62 = vld [vmem:[%s1123_s19 + $0xc0] sm:$0xff]  ;;  %v351_v21 = vmul.f32 %v1410_v43, %v1396_v6 }
  0x70   : > { %v429_v0 = vmul.f32 %v425_v10, %v279_v24  ;;  %v437_v54 = vmul.f32 %v425_v10, %v283_v19  ;;  %v445_v15 = vmul.f32 %v425_v10, %v287_v51  ;;  %v516_v27 = vmul.f32 %v1269_v22, %v1399_v7  ;;  %v915_v5 = vpop.eup %914 }
  0x71   : > { %v460_v42 = vadd.f32 %v456_v35, %v452_v57  ;;  %v359_v36 = vmul.f32 %v1413_v59, %v288_v53  ;;  %v324_v18 = vadd.f32 %v320_v13, %v316_v32  ;;  %vm473_vm1 = vcmp.gt.f32.partialorder %v1385_v61, 0.0 }
  0x72   : > { %v433_v24 = vsub.f32 %v429_v0, %v1354_v20  ;;  %v441_v19 = vsub.f32 %v437_v54, %v1357_v8  ;;  %v449_v51 = vsub.f32 %v445_v15, %v1360_v9  ;;  %v521_v11 = vadd.f32 %v1272_v26, %v516_v27  ;;  %v917_v33 = vpop.eup %916 }
  0x73   : > { %v468_v31 = vadd.f32 %v464_v3, %v460_v42  ;;  %v1429_v8 = vmul.f32 %v791_v62, %v520_v37  ;;  %v355_v9 = vadd.f32 %v351_v21, %v347_v14  ;;  %v414_v60 = vmul.f32 %v915_v5, %v1289_v41 }
  0x74   : > { %v453_v50 = vmul.f32 %v433_v24, %v413_v40  ;;  %v457_v55 = vmul.f32 %v441_v19, %v417_v63  ;;  %v465_v56 = vmul.f32 %v449_v51, %v421_v48  ;;  %v1432_v58 = vmul.f32 %v792_v17, %v521_v11 }
  0x75   : > { %v476_v20 = vmax.f32 %v468_v31, 0.0  ;;  %v418_v4 = vmul.f32 %v915_v5, %v1292_v45  ;;  %v422_v13 = vmul.f32 %v915_v5, %v1298_v52  ;;  %v1438_v40 = vadd.f32 %v359_v36, %v355_v9 }
  0x76   : > { %v461_v28 = vadd.f32 %v457_v55, %v453_v50  ;;  %v328_v63 = vmax.f32 %v324_v18, 1e-12  ;;  %v1442_v48 = vsub.f32 %v1186_v29, %v1318_v30  ;;  %v387_v41 = vmul.f32 %v1377_v47, %v1377_v47 }
  0x77   : > { %v480_v32 = vsel %vm472_vm0, %v476_v20, 0.0  ;;  %v391_v45 = vmul.f32 %v1380_v16, %v1380_v16  ;;  %v426_v52 = vmul.f32 2.0, %v1438_v40  ;;  %v1452_v12 = vmul.f32 %v917_v33, %v1281_v38 }
  0x78   : > { %v484_v10 = vmul.f32 %v480_v32, %v480_v32  ;;  %v469_v57 = vadd.f32 %v465_v56, %v461_v28  ;;  %v1455_v35 = vmul.f32 %v917_v33, %v1284_v39  ;;  %918 = vrsqrt.f32 %v328_v63 }
  0x79   : > { %v395_v3 = vadd.f32 %v391_v45, %v387_v41  ;;  %v399_v37 = vmul.f32 %v1442_v48, %v1442_v48  ;;  %v1464_v0 = vmax.f32 %v1438_v40, 0.0  ;;  %v430_v38 = vmul.f32 %v426_v52, %v1390_v25 }
  0x7a   : > { %v488_v29 = vmul.f32 %v484_v10, %v484_v10  ;;  %v477_v30 = vmax.f32 %v469_v57, 0.0  ;;  %v438_v54 = vmul.f32 %v426_v52, %v1396_v6  ;;  %v446_v39 = vmul.f32 %v426_v52, %v288_v53  ;;  %v796_v52 = vld [vmem:[%s1123_s19 + $0xe8] sm:$0xff] }
  0x7b   : > { %v403_v42 = vadd.f32 %v399_v37, %v395_v3  ;;  %v1471_v14 = vstv %s1427_s3  ;;  %v434_v62 = vsub.f32 %v430_v38, %v1404_v49  ;;  %v1477_v6 = vmul.f32 %v917_v33, %v1295_v46 }
  0x7c   : > { %v492_v15 = vmul.f32 %v488_v29, %v488_v29  ;;  %v481_v27 = vsel %vm473_vm1, %v477_v30, 0.0  ;;  %v442_v24 = vsub.f32 %v438_v54, %v1410_v43  ;;  %v450_v25 = vsub.f32 %v446_v39, %v1413_v59  ;;  %v795_v43 = vld [vmem:[%s1123_s19 + $0xe0] sm:$0xff] }
  0x7d   : > { %v485_v5 = vmul.f32 %v481_v27, %v481_v27  ;;  %v407_v53 = vmax.f32 %v403_v42, 1e-12  ;;  %v548_v61 = vmul.f32 %v1471_v14, %v1372_v44  ;;  %v454_v11 = vmul.f32 %v434_v62, %v414_v60 }
  0x7e   : > { %v496_v19 = vmul.f32 %v492_v15, %v492_v15  ;;  %v458_v31 = vmul.f32 %v442_v24, %v418_v4  ;;  %v466_v17 = vmul.f32 %v450_v25, %v422_v13  ;;  %vm474_vm2 = vcmp.gt.f32.partialorder %v1438_v40, 0.0 }
  0x7f   : > { %v489_v51 = vmul.f32 %v485_v5, %v485_v5  ;;  %920 = vrsqrt.f32 %v407_v53  ;;  %v1484_v59 = vstv %s1448_s4  ;;  %v517_v21 = vmul.f32 %v1269_v22, %v1464_v0 }
  0x80   : > { %v500_v49 = vmul.f32 %v496_v19, %v496_v19  ;;  %v462_v33 = vadd.f32 %v458_v31, %v454_v11  ;;  %v553_v36 = vadd.f32 %v1484_v59, %v548_v61  ;;  %v1495_v50 = vstv %s1459_s5  ;;  %v803_v19 = vld [vmem:[%s1123_s19 + $0x100] sm:$0xff] }
  0x81   : > { %v493_v46 = vmul.f32 %v489_v51, %v489_v51  ;;  %v549_v55 = vmul.f32 %v1471_v14, %v1399_v7  ;;  %v1500_v56 = vstv %s1461_s8  ;;  %v550_v38 = vmul.f32 %v1471_v14, %v1464_v0 }
  0x82   : > { %v504_v18 = vmul.f32 %v500_v49, %v500_v49  ;;  %v919_v20 = vpop.eup %918  ;;  %v470_v60 = vadd.f32 %v466_v17, %v462_v33  ;;  %v557_v28 = vmul.f32 %v795_v43, %v553_v36  ;;  %v582_v4 = vmul.f32 %v1500_v56, %v1372_v44 }
  0x83   : > { %v497_v9 = vmul.f32 %v493_v46, %v493_v46  ;;  %v1506_v32 = vmul.f32 %v919_v20, %v1321_v34  ;;  %v1509_v63 = vmul.f32 %v919_v20, %v1333_v1  ;;  %v1512_v10 = vmul.f32 %v919_v20, %v1343_v23 }
  0x84   : > { %v529_v13 = vmul.f32 %v1336_v2, %v504_v18  ;;  %v478_v41 = vmax.f32 %v470_v60, 0.0  ;;  %v562_v45 = vmul.f32 %v1495_v50, %v504_v18  ;;  %v554_v44 = vadd.f32 %v1484_v59, %v549_v55  ;;  %v793_v55 = vld [vmem:[%s1123_s19 + $0xd0] sm:$0xff] }
  0x85   : > { %v501_v57 = vmul.f32 %v497_v9, %v497_v9  ;;  %v348_v34 = vmul.f32 %v1506_v32, %v1452_v12  ;;  %v352_v1 = vmul.f32 %v1509_v63, %v1455_v35  ;;  %v360_v23 = vmul.f32 %v1512_v10, %v1477_v6  ;;  %v797_v9 = vld [vmem:[%s1123_s19 + $0xf0] sm:$0xff] }
  0x86   : > { %v533_v29 = vadd.f32 %v529_v13, %v1429_v8  ;;  %v482_v3 = vsel %vm474_vm2, %v478_v41, 0.0  ;;  %v566_v37 = vadd.f32 %v562_v45, %v557_v28  ;;  %v558_v39 = vmul.f32 %v796_v52, %v554_v44 }
  0x87   : > { %v505_v30 = vmul.f32 %v501_v57, %v501_v57  ;;  %v486_v8 = vmul.f32 %v482_v3, %v482_v3  ;;  %v356_v54 = vadd.f32 %v352_v1, %v348_v34  ;;  %v1534_v15 = vstv %s1486_s7  ;;  %v805_v34 = vld [vmem:[%s1123_s19 + $0x110] sm:$0xff] }
  0x88   : > { %537 = vst [vmem:[%s1530_s17] sm:$0xff] %v533_v29  ;;  %799 = vst [vmem:[%s1530_s17 + $0x20] sm:$0xff] %v566_v37  ;;  %v587_v42 = vadd.f32 %v1534_v15, %v582_v4  ;;  %v1541_v5 = vstv %s1492_s6  ;;  %v522_v61 = vadd.f32 %v1272_v26, %v517_v21  ;;  %v555_v51 = vadd.f32 %v1484_v59, %v550_v38 }
  0x89   : > { %v530_v27 = vmul.f32 %v1336_v2, %v505_v30  ;;  %v563_v40 = vmul.f32 %v1495_v50, %v505_v30  ;;  %v921_v62 = vpop.eup %920  ;;  %v490_v24 = vmul.f32 %v486_v8, %v486_v8  ;;  %v364_v25 = vadd.f32 %v360_v23, %v356_v54 }
  0x8a   : > { %v596_v11 = vmul.f32 %v1541_v5, %v504_v18  ;;  %v415_v17 = vmul.f32 %v921_v62, %v1377_v47  ;;  %v419_v49 = vmul.f32 %v921_v62, %v1380_v16  ;;  %v423_v46 = vmul.f32 %v921_v62, %v1442_v48  ;;  %v804_v16 = vld [vmem:[%s1123_s19 + $0x108] sm:$0xff] }
  0x8b   : > { %v534_v53 = vadd.f32 %v530_v27, %v1432_v58  ;;  %v494_v31 = vmul.f32 %v490_v24, %v490_v24  ;;  %v427_v43 = vmul.f32 2.0, %v364_v25  ;;  %v567_v33 = vadd.f32 %v563_v40, %v558_v39 }
  0x8c   : > { %v591_v58 = vmul.f32 %v803_v19, %v587_v42  ;;  %v583_v21 = vmul.f32 %v1500_v56, %v1399_v7  ;;  %v597_v28 = vmul.f32 %v1541_v5, %v505_v30  ;;  %v526_v57 = vmul.f32 %v793_v55, %v522_v61 }
  0x8d   : > { %538 = vst [vmem:[%s1530_s17 + $0x8] sm:$0xff] %v534_v53  ;;  %v498_v36 = vmul.f32 %v494_v31, %v494_v31  ;;  %v431_v18 = vmul.f32 %v427_v43, %v1452_v12  ;;  %v439_v20 = vmul.f32 %v427_v43, %v1455_v35  ;;  %v447_v47 = vmul.f32 %v427_v43, %v1477_v6 }
  0x8e   : > { %800 = vst [vmem:[%s1530_s17 + $0x28] sm:$0xff] %v567_v33  ;;  %v600_v60 = vadd.f32 %v596_v11, %v591_v58  ;;  %v588_v48 = vadd.f32 %v1534_v15, %v583_v21  ;;  %v559_v35 = vmul.f32 %v797_v9, %v555_v51  ;;  %v584_v41 = vmul.f32 %v1500_v56, %v1464_v0 }
  0x8f   : > { %v502_v4 = vmul.f32 %v498_v36, %v498_v36  ;;  %v435_v7 = vsub.f32 %v431_v18, %v1506_v32  ;;  %v443_v13 = vsub.f32 %v439_v20, %v1509_v63  ;;  %v451_v12 = vsub.f32 %v447_v47, %v1512_v10 }
  0x90   : > { %807 = vst [vmem:[%s1530_s17 + $0x40] sm:$0xff] %v600_v60  ;;  %v592_v6 = vmul.f32 %v804_v16, %v588_v48  ;;  %v589_v63 = vadd.f32 %v1534_v15, %v584_v41  ;;  %vm475_vm3 = vcmp.gt.f32.partialorder %v364_v25, 0.0  ;;  %v368_v39 = vmax.f32 %v364_v25, 0.0  ;;  %v794_v25 = vld [vmem:[%s1123_s19 + $0xd8] sm:$0xff] }
  0x91   : > { %v506_v45 = vmul.f32 %v502_v4, %v502_v4  ;;  %v455_v52 = vmul.f32 %v435_v7, %v415_v17  ;;  %v459_v44 = vmul.f32 %v443_v13, %v419_v49  ;;  %v467_v29 = vmul.f32 %v451_v12, %v423_v46  ;;  %v798_v17 = vld [vmem:[%s1123_s19 + $0xf8] sm:$0xff] }
  0x92   : > { %v601_v32 = vadd.f32 %v597_v28, %v592_v6  ;;  %v593_v0 = vmul.f32 %v805_v34, %v589_v63  ;;  %v518_v62 = vmul.f32 %v1269_v22, %v368_v39  ;;  %v551_v24 = vmul.f32 %v1471_v14, %v368_v39  ;;  %v806_v49 = vld [vmem:[%s1123_s19 + $0x118] sm:$0xff] }
  0x93   : > { %v531_v10 = vmul.f32 %v1336_v2, %v506_v45  ;;  %v463_v1 = vadd.f32 %v459_v44, %v455_v52  ;;  %v564_v23 = vmul.f32 %v1495_v50, %v506_v45  ;;  %v598_v30 = vmul.f32 %v1541_v5, %v506_v45 }
  0x94   : > { %808 = vst [vmem:[%s1530_s17 + $0x48] sm:$0xff] %v601_v32  ;;  %v585_v19 = vmul.f32 %v1500_v56, %v368_v39  ;;  %v523_v51 = vadd.f32 %v1272_v26, %v518_v62  ;;  %v556_v11 = vadd.f32 %v1484_v59, %v551_v24 }
  0x95   : > { %v535_v3 = vadd.f32 %v531_v10, %v526_v57  ;;  %v471_v37 = vadd.f32 %v467_v29, %v463_v1  ;;  %v568_v38 = vadd.f32 %v564_v23, %v559_v35  ;;  %v602_v8 = vadd.f32 %v598_v30, %v593_v0 }
  0x96   : > { %v590_v31 = vadd.f32 %v1534_v15, %v585_v19  ;;  %v527_v14 = vmul.f32 %v794_v25, %v523_v51  ;;  %v560_v46 = vmul.f32 %v798_v17, %v556_v11 }
  0x97   : > { %539 = vst [vmem:[%s1530_s17 + $0x10] sm:$0xff] %v535_v3  ;;  %v479_v54 = vmax.f32 %v471_v37, 0.0  ;;  %801 = vst [vmem:[%s1530_s17 + $0x30] sm:$0xff] %v568_v38 }
  0x98   : > { %809 = vst [vmem:[%s1530_s17 + $0x50] sm:$0xff] %v602_v8  ;;  %v594_v56 = vmul.f32 %v806_v49, %v590_v31 }
  0x99   : > { %v483_v27 = vsel %vm475_vm3, %v479_v54, 0.0 }
  0x9a   : > { %v487_v40 = vmul.f32 %v483_v27, %v483_v27 }
  0x9c   : > { %v491_v42 = vmul.f32 %v487_v40, %v487_v40 }
  0x9e   : > { %v495_v53 = vmul.f32 %v491_v42, %v491_v42 }
  0xa0   : > { %v499_v61 = vmul.f32 %v495_v53, %v495_v53 }
  0xa2   : > { %v503_v22 = vmul.f32 %v499_v61, %v499_v61 }
  0xa4   : > { %v507_v43 = vmul.f32 %v503_v22, %v503_v22 }
  0xa6   : > { %v532_v33 = vmul.f32 %v1336_v2, %v507_v43  ;;  %v565_v26 = vmul.f32 %v1495_v50, %v507_v43  ;;  %v599_v59 = vmul.f32 %v1541_v5, %v507_v43 }
  0xa8   : > { %v536_v58 = vadd.f32 %v532_v33, %v527_v14  ;;  %v569_v21 = vadd.f32 %v565_v26, %v560_v46  ;;  %v603_v15 = vadd.f32 %v599_v59, %v594_v56 }
  0xaa   : > { %540 = vst [vmem:[%s1530_s17 + $0x18] sm:$0xff] %v536_v58  ;;  %802 = vst [vmem:[%s1530_s17 + $0x38] sm:$0xff] %v569_v21 }
  0xab   : > { %810 = vst [vmem:[%s1530_s17 + $0x58] sm:$0xff] %v603_v15 }
  0xac   : > { %s816_s19 = sshll.u32 %s1029_s13, 9  ;;  %s639_s24 = sshll.u32 %s1530_s17, 4  ;;  %s640_s24 = int_to_ptr.vmem [resolvable:$true] %s639_s24 }
  0xad   : > { %s622_s20 = scalar_lea.hbm %s1633_s2, %s816_s19  ;;  %s986_s27 = smov 512  }
  0xae   : > { %833 = sst [smem:[#allocation11]] (%p1060_p11), %s986_s27  ;;  %s987_s16 = smov 1024  }
  0xaf   : > { %834 = sst [smem:[#allocation11 + $0x1]] (%p1060_p11), %s987_s16  ;;  %s988_s28 = smov 4  }
  0xb0   : > { %835 = sst [smem:[#allocation11 + $0x2]] (%p1060_p11), %s988_s28  ;;  %s989_s29 = smov 128  }
  0xb1   : > { %836 = sst [smem:[#allocation11 + $0x3]] (%p1060_p11), %s989_s29  ;;  %s990_s13 = smov 8  }
  0xb2   : > { %837 = sst [smem:[#allocation11 + $0x4]] (%p1060_p11), %s989_s29  ;;  %s991_s30 = smov [#allocation10]  }
  0xb3   : > { %838 = sst [smem:[#allocation11 + $0x5]] (%p1060_p11), %s990_s13  ;;  %s992_s3 = smov 0  }
  0xb4   : > { %839 = dma.general (%p1060_p11), %s640_s24, 1536, %s622_s20, %s610_s23, %s991_s30, [#allocation11], %s992_s3, 0  }
  0xb5 PF: > { %s667_s4 = sand.u32 1, %s965_s9   ;;  %p846_p4 = pnand %p750_p1, %p1064_p12 }
  0xb6   : > { %s668_s5 = scalar_lea.sflag [#allocation4], %s667_s4 }
  0xb7   : > { %960 = dma.done.wait (!%p846_p4), %s668_s5, 1536  }
  0xb8   : > { %962 = vsyncadd (!%p846_p4), %s668_s5, 4294965760  ;;  %p16_p5 = scmp.ge.s32.totalorder %s1033_s15, 4   ;;  %s1639_s9 = smov %s969_s10 }
  0xb9   : > { %s1640_s10 = smov %s973_s11  ;;  %s1641_s11 = smov %s1045_s18 }
  0xba   : > { %s1642_s12 = smov %s1033_s15  ;;  %18 = sbr.rel (!%p16_p5) target bundleno = 6 (0x6), region = 98 }
  0xc1   :  { %673 = vsyncpa [#allocation3], 1 }
  0xc2   :  { %675 = vsyncpa [#allocation3 + $0x1], 1 }
  0xc3   :  { %676 = vsyncpa [#allocation4], 1 }
  0xc4   :  { %678 = vsyncpa [#allocation4 + $0x1], 1 }
  0xc5   :  { %679 = vsyncpa [#allocation5], 1 }
  0xc6   :  { %681 = vsyncpa [#allocation5 + $0x1], 1 }

</bundles_post_ra>
